<compile_context>
chip_gen: v7x
topology: tpu7x:2x2x1
jax: 0.10.0
libtpu: 0.0.40
codegen_flags: <defaults>
</compile_context>

<pallas_src>
import functools
import math

import jax
import jax.numpy as jnp
from jax.experimental import pallas as pl
from jax.experimental.pallas import tpu as pltpu


def _round_up(x, m):
    return ((x + m - 1) // m) * m


def _pick_tile(extent, preferred):
    """Largest 8-aligned tile <= `preferred` that does not exceed the extent."""
    if extent >= preferred:
        return preferred
    if extent >= 8:
        return (extent // 8) * 8
    return extent  # tiny dim: block == full extent (allowed even if not 8-aligned)


@functools.lru_cache(maxsize=1)
def _vmem_limit_bytes():
    """Per-generation scoped-VMEM budget: ~80% of physical VMEM."""
    try:
        cap = pltpu.get_tpu_info().vmem_capacity_bytes
        if cap:
            return int(cap * 0.8)
    except Exception:
        pass
    return 32 * 1024 * 1024  # conservative fallback (safe on every generation)


# --------------------------------------------------------------------------
# Linear:  y = x @ W^T + b      (W passed pre-transposed, in bf16)
# Grid: (n_tiles, row_tiles, k_tiles)  -- weight block constant across the row
# loop when K is untiled (weight-stationary), kv reduction innermost otherwise.
# --------------------------------------------------------------------------
def _linear_kernel(x_ref, w_ref, b_ref, o_ref, acc_ref):
    kk = pl.program_id(2)

    @pl.when(kk == 0)
    def _():
        acc_ref[...] = jnp.zeros_like(acc_ref)

    acc_ref[...] += jnp.dot(
        x_ref[...].astype(jnp.bfloat16),        # bf16 MXU inputs, f32 accumulate
        w_ref[...],
        preferred_element_type=jnp.float32,
    )

    @pl.when(kk == pl.num_programs(2) - 1)
    def _():
        o_ref[...] = (acc_ref[...] + b_ref[...]).astype(o_ref.dtype)


def linear_pallas(x2d, w, b, *, out_dtype=None, tile_rows=512):
    """x2d: [rows, d_in];  w: [d_out, d_in] (torch Linear layout);  b: [d_out]."""
    rows, d_in = x2d.shape
    d_out = w.shape[0]
    out_dtype = out_dtype or x2d.dtype

    # Row tile: large (512) for HBM roofline; ragged last tile handled by Pallas
    # (no host-side jnp.pad pass over the activation).
    tile_m = _pick_tile(rows, tile_rows)

    # N tile: whole weight panel for moderate d_out, else MXU-wide 512/256 tiles
    # (v6e/v7x MXUs are 256 wide -- no 128 fallback).
    if d_out <= 1024:
        tile_n = d_out
    elif d_out % 512 == 0:
        tile_n = 512
    elif d_out % 256 == 0:
        tile_n = 256
    else:
        tile_n = d_out

    # K tiling only when the full-K x/w panels (double buffered) would eat more
    # than ~1/4 of the VMEM budget (matters for very large d_in, esp. v7x 64 MiB).
    x_bytes = jnp.dtype(x2d.dtype).itemsize
    full_k_bytes = 2 * d_in * (tile_m * x_bytes + tile_n * 2)
    if full_k_bytes > _vmem_limit_bytes() // 4 and d_in % 512 == 0:
        tile_k = 512
    else:
        tile_k = d_in

    w_t = w.T.astype(jnp.bfloat16)              # (d_in, d_out); bf16 halves weight DMA
    b2d = b.reshape(1, d_out).astype(jnp.float32)

    grid = (d_out // tile_n, pl.cdiv(rows, tile_m), d_in // tile_k)
    return pl.pallas_call(
        _linear_kernel,
        out_shape=jax.ShapeDtypeStruct((rows, d_out), out_dtype),
        grid=grid,
        in_specs=[
            pl.BlockSpec((tile_m, tile_k), lambda j, i, kk: (i, kk)),
            pl.BlockSpec((tile_k, tile_n), lambda j, i, kk: (kk, j)),  # stationary over i
            pl.BlockSpec((1, tile_n), lambda j, i, kk: (0, j)),
        ],
        out_specs=pl.BlockSpec((tile_m, tile_n), lambda j, i, kk: (i, j)),
        scratch_shapes=[pltpu.VMEM((tile_m, tile_n), jnp.float32)],
        compiler_params=pltpu.CompilerParams(
            dimension_semantics=("parallel", "parallel", "arbitrary"),
            vmem_limit_bytes=_vmem_limit_bytes(),
        ),
    )(x2d, w_t, b2d)


# --------------------------------------------------------------------------
# Fused multi-head flash attention.
# Consumes (B, S, dim) projections directly (head split inside the kernel),
# online softmax over kv tiles, writes merged (B, S, dim) context (lane-dense).
# --------------------------------------------------------------------------
def _mha_flash_kernel(q_ref, k_ref, v_ref, o_ref, m_ref, l_ref, acc_ref,
                      *, h, d_k, scale, seq_len, tile_kv):
    ki = pl.program_id(2)

    @pl.when(ki == 0)
    def _():
        m_ref[...] = jnp.full_like(m_ref, -jnp.inf)
        l_ref[...] = jnp.zeros_like(l_ref)
        acc_ref[...] = jnp.zeros_like(acc_ref)

    ragged_kv = (seq_len % tile_kv) != 0
    if ragged_kv:  # mask out-of-range keys of the ragged last kv tile
        tq = q_ref.shape[1]
        kv_row = ki * tile_kv + jax.lax.broadcasted_iota(jnp.int32, (tile_kv, 1), 0)
        v_valid = kv_row < seq_len                                         # (tk, 1)
        s_valid = (ki * tile_kv
                   + jax.lax.broadcasted_iota(jnp.int32, (tq, tile_kv), 1)) < seq_len

    for hh in range(h):                                    # h is small & static
        sl = slice(hh * d_k, (hh + 1) * d_k)
        # Fold 1/sqrt(d_k) into the (tq, d_k) Q tile (S/d_k less VPU work than
        # scaling the (tq, tk) score block).
        q_h = (q_ref[0, :, sl].astype(jnp.float32) * scale).astype(jnp.bfloat16)
        k_h = k_ref[0, :, sl].astype(jnp.bfloat16)
        v_h = v_ref[0, :, sl].astype(jnp.bfloat16)
        if ragged_kv:
            v_h = jnp.where(v_valid, v_h, jnp.zeros_like(v_h))

        s = jax.lax.dot_general(                           # (tq, tk) = q_h @ k_h^T
            q_h, k_h, (((1,), (1,)), ((), ())),
            preferred_element_type=jnp.float32)
        if ragged_kv:
            s = jnp.where(s_valid, s, -jnp.inf)

        m_prev = m_ref[hh]                                                 # (tq, 1)
        m_new = jnp.maximum(m_prev, jnp.max(s, axis=-1, keepdims=True))
        alpha = jnp.exp(m_prev - m_new)
        p = jnp.exp(s - m_new)
        l_ref[hh] = alpha * l_ref[hh] + jnp.sum(p, axis=-1, keepdims=True)
        m_ref[hh] = m_new
        acc_ref[:, sl] = alpha * acc_ref[:, sl] + jax.lax.dot_general(
            p.astype(jnp.bfloat16), v_h, (((1,), (0,)), ((), ())),
            preferred_element_type=jnp.float32)

    @pl.when(ki == pl.num_programs(2) - 1)
    def _():
        for hh in range(h):
            sl = slice(hh * d_k, (hh + 1) * d_k)
            acc_ref[:, sl] = acc_ref[:, sl] * pl.reciprocal(l_ref[hh], approx=False)
        o_ref[0] = acc_ref[...].astype(o_ref.dtype)        # one lane-dense store


def attention_pallas(Q, K, V, h, *, tile_q=256, tile_kv=256, out_dtype=None):
    """Q/K/V: (B, S, dim) projection outputs -> (B, S, dim) merged-head context."""
    B, S, dim = Q.shape
    d_k = dim // h
    out_dtype = out_dtype or Q.dtype

    tq = _pick_tile(S, tile_q)
    tk = _pick_tile(S, tile_kv)

    q_spec = pl.BlockSpec((1, tq, dim), lambda b, qi, ki: (b, qi, 0))
    kv_spec = pl.BlockSpec((1, tk, dim), lambda b, qi, ki: (b, ki, 0))
    out_spec = pl.BlockSpec((1, tq, dim), lambda b, qi, ki: (b, qi, 0))

    kernel = functools.partial(
        _mha_flash_kernel, h=h, d_k=d_k, scale=1.0 / math.sqrt(d_k),
        seq_len=S, tile_kv=tk)

    return pl.pallas_call(
        kernel,
        out_shape=jax.ShapeDtypeStruct((B, S, dim), out_dtype),
        grid=(B, pl.cdiv(S, tq), pl.cdiv(S, tk)),
        in_specs=[q_spec, kv_spec, kv_spec],
        out_specs=out_spec,
        scratch_shapes=[
            pltpu.VMEM((h, tq, 1), jnp.float32),   # running max per head
            pltpu.VMEM((h, tq, 1), jnp.float32),   # running denominator per head
            pltpu.VMEM((tq, dim), jnp.float32),    # f32 context accumulator
        ],
        compiler_params=pltpu.CompilerParams(
            dimension_semantics=("parallel", "parallel", "arbitrary"),
            vmem_limit_bytes=_vmem_limit_bytes(),
        ),
    )(Q, K, V)


# --------------------------------------------------------------------------
# Full MultiHeadAttention forward (no host-side head transposes).
# --------------------------------------------------------------------------
def multi_head_attention(q, k, v, params, h):
    B, S, dim = q.shape

    def proj(x, w, b, out_dtype):
        return linear_pallas(
            x.reshape(B * S, dim), w, b, out_dtype=out_dtype).reshape(B, S, dim)

    # bf16 projection outputs: halves HBM write traffic and attention input DMA.
    Q = proj(q, params["wq"], params["bq"], jnp.bfloat16)
    K = proj(k, params["wk"], params["bk"], jnp.bfloat16)
    V = proj(v, params["wv"], params["bv"], jnp.bfloat16)

    ctx = attention_pallas(Q, K, V, h, out_dtype=jnp.bfloat16)   # (B, S, dim)

    out = linear_pallas(ctx.reshape(B * S, dim), params["wo"], params["bo"],
                        out_dtype=jnp.float32)
    return out.reshape(B, S, dim)


# --------------------------------------------------------------------------
# Pure-JAX f32 reference mirroring the PyTorch forward.
# --------------------------------------------------------------------------
def _reference(q, k, v, params, h):
    B, S, dim = q.shape
    d_k = dim // h

    def lin(x, w, b):
        return jnp.einsum("bsd,od->bso", x, w) + b

    def split(x):
        return x.reshape(B, S, h, d_k).transpose(0, 2, 1, 3)

    Q = split(lin(q, params["wq"], params["bq"]))
    K = split(lin(k, params["wk"], params["bk"]))
    V = split(lin(v, params["wv"], params["bv"]))

    scores = jnp.einsum("bhqd,bhkd->bhqk", Q, K) / math.sqrt(d_k)
    attn = jax.nn.softmax(scores, axis=-1)
    ctx = jnp.einsum("bhqk,bhkd->bhqd", attn, V)
    ctx = ctx.transpose(0, 2, 1, 3).reshape(B, S, dim)
    return lin(ctx, params["wo"], params["bo"])


if __name__ == "__main__":
    B, S, DIM, H = 2, 8, 32, 4  # batch, seq, hidden, heads (dim % h == 0)

    key = jax.random.PRNGKey(0)
    ks = jax.random.split(key, 11)
    q = jax.random.normal(ks[0], (B, S, DIM), dtype=jnp.float32)
    k = jax.random.normal(ks[1], (B, S, DIM), dtype=jnp.float32)
    v = jax.random.normal(ks[2], (B, S, DIM), dtype=jnp.float32)

    params = {
        "wq": jax.random.normal(ks[3], (DIM, DIM), dtype=jnp.float32) * 0.1,
        "bq": jax.random.normal(ks[4], (DIM,), dtype=jnp.float32) * 0.1,
        "wk": jax.random.normal(ks[5], (DIM, DIM), dtype=jnp.float32) * 0.1,
        "bk": jax.random.normal(ks[6], (DIM,), dtype=jnp.float32) * 0.1,
        "wv": jax.random.normal(ks[7], (DIM, DIM), dtype=jnp.float32) * 0.1,
        "bv": jax.random.normal(ks[8], (DIM,), dtype=jnp.float32) * 0.1,
        "wo": jax.random.normal(ks[9], (DIM, DIM), dtype=jnp.float32) * 0.1,
        "bo": jax.random.normal(ks[10], (DIM,), dtype=jnp.float32) * 0.1,
    }

    out = multi_head_attention(q, k, v, params, H)
    out = jax.block_until_ready(out)

    ref = _reference(q, k, v, params, H)
    assert out.shape == (B, S, DIM)
    # bf16 MXU inputs and bf16 intermediate storage (f32 accumulation everywhere)
    # -> loosened tolerance.
    assert jnp.allclose(out, ref, atol=2e-2, rtol=2e-2), "mismatch vs reference"

    print("KERNEL_OK")
</pallas_src>

<mosaic_0001>
module attributes {stable_mosaic.version = 11 : i64} {
  func.func @_linear_kernel(%arg0: i32, %arg1: i32, %arg2: i32, %arg3: memref<16x32xf32, #tpu.memory_space<vmem>>, %arg4: memref<32x32xbf16, #tpu.memory_space<vmem>>, %arg5: memref<1x32xf32, #tpu.memory_space<vmem>>, %arg6: memref<16x32xbf16, #tpu.memory_space<vmem>>, %arg7: memref<16x32xf32, #tpu.memory_space<vmem>>) attributes {dimension_semantics = [#tpu.dimension_semantics<parallel>, #tpu.dimension_semantics<parallel>, #tpu.dimension_semantics<arbitrary>], iteration_bounds = array<i64: 1, 1, 1>, scalar_prefetch = 0 : i64, scratch_operands = 1 : i64, tpu.core_type = #tpu.core_type<tc>, window_params = [{transform_indices = @transform_0, window_bounds = array<i64: 16, 32>}, {transform_indices = @transform_1, window_bounds = array<i64: 32, 32>}, {transform_indices = @transform_2, window_bounds = array<i64: 1, 32>}, {transform_indices = @transform_3, window_bounds = array<i64: 16, 32>}]} {
    %c0_i32 = arith.constant 0 : i32
    %0 = arith.cmpi eq, %arg2, %c0_i32 : i32
    %1 = arith.extui %0 : i1 to i32
    %c0_i32_0 = arith.constant 0 : i32
    %2 = arith.cmpi ne, %1, %c0_i32_0 : i32
    scf.if %2 {
      %cst_10 = arith.constant 0.000000e+00 : f32
      %13 = vector.broadcast %cst_10 : f32 to vector<16x32xf32>
      %c0_11 = arith.constant 0 : index
      %c0_12 = arith.constant 0 : index
      %14 = vector.load %arg7[%c0_11, %c0_12] : memref<16x32xf32, #tpu.memory_space<vmem>>, vector<16x32xf32>
      tpu.vector_store %arg7[%c0_11, %c0_12], %13 {strides = array<i32>} : memref<16x32xf32, #tpu.memory_space<vmem>>, vector<16x32xf32>,
    } else {
    }
    %c0 = arith.constant 0 : index
    %c0_1 = arith.constant 0 : index
    %3 = vector.load %arg7[%c0, %c0_1] : memref<16x32xf32, #tpu.memory_space<vmem>>, vector<16x32xf32>
    %c0_2 = arith.constant 0 : index
    %c0_3 = arith.constant 0 : index
    %4 = vector.load %arg3[%c0_2, %c0_3] : memref<16x32xf32, #tpu.memory_space<vmem>>, vector<16x32xf32>
    %5 = arith.truncf %4 : vector<16x32xf32> to vector<16x32xbf16>
    %c0_4 = arith.constant 0 : index
    %c0_5 = arith.constant 0 : index
    %6 = vector.load %arg4[%c0_4, %c0_5] : memref<32x32xbf16, #tpu.memory_space<vmem>>, vector<32x32xbf16>
    %cst = arith.constant dense<0.000000e+00> : vector<16x32xf32>
    %7 = tpu.matmul %5, %6, %cst {dimension_numbers = #tpu.dot_dimension_numbers<[1], [0], [0], [1], [0, 0, 1, 1], [], []>} : vector<16x32xbf16>, vector<32x32xbf16>, vector<16x32xf32> -> vector<16x32xf32>
    %8 = arith.addf %3, %7 : vector<16x32xf32>
    %c0_6 = arith.constant 0 : index
    %c0_7 = arith.constant 0 : index
    %9 = vector.load %arg7[%c0_6, %c0_7] : memref<16x32xf32, #tpu.memory_space<vmem>>, vector<16x32xf32>
    tpu.vector_store %arg7[%c0_6, %c0_7], %8 {strides = array<i32>} : memref<16x32xf32, #tpu.memory_space<vmem>>, vector<16x32xf32>,
    %c0_i32_8 = arith.constant 0 : i32
    %10 = arith.cmpi eq, %arg2, %c0_i32_8 : i32
    %11 = arith.extui %10 : i1 to i32
    %c0_i32_9 = arith.constant 0 : i32
    %12 = arith.cmpi ne, %11, %c0_i32_9 : i32
    scf.if %12 {
      %c0_10 = arith.constant 0 : index
      %c0_11 = arith.constant 0 : index
      %13 = vector.load %arg7[%c0_10, %c0_11] : memref<16x32xf32, #tpu.memory_space<vmem>>, vector<16x32xf32>
      %c0_12 = arith.constant 0 : index
      %c0_13 = arith.constant 0 : index
      %14 = vector.load %arg5[%c0_12, %c0_13] : memref<1x32xf32, #tpu.memory_space<vmem>>, vector<1x32xf32>
      %15 = vector.broadcast %14 : vector<1x32xf32> to vector<16x32xf32>
      %16 = arith.addf %13, %15 : vector<16x32xf32>
      %17 = arith.truncf %16 : vector<16x32xf32> to vector<16x32xbf16>
      %c0_14 = arith.constant 0 : index
      %c0_15 = arith.constant 0 : index
      %18 = vector.load %arg6[%c0_14, %c0_15] : memref<16x32xbf16, #tpu.memory_space<vmem>>, vector<16x32xbf16>
      tpu.vector_store %arg6[%c0_14, %c0_15], %17 {strides = array<i32>} : memref<16x32xbf16, #tpu.memory_space<vmem>>, vector<16x32xbf16>,
    } else {
    }
    return
  }
  func.func @transform_0(%arg0: i32, %arg1: i32, %arg2: i32) -> (i32, i32) {
    %c0_i32 = arith.constant 0 : i32
    return %arg1, %arg2 : i32, i32
  }
  func.func @transform_1(%arg0: i32, %arg1: i32, %arg2: i32) -> (i32, i32) {
    %c0_i32 = arith.constant 0 : i32
    return %arg2, %arg0 : i32, i32
  }
  func.func @transform_2(%arg0: i32, %arg1: i32, %arg2: i32) -> (i32, i32) {
    %c0_i32 = arith.constant 0 : i32
    %c0_i32_0 = arith.constant 0 : i32
    return %c0_i32, %arg0 : i32, i32
  }
  func.func @transform_3(%arg0: i32, %arg1: i32, %arg2: i32) -> (i32, i32) {
    %c0_i32 = arith.constant 0 : i32
    return %arg1, %arg0 : i32, i32
  }
}

</mosaic_0001>

<bundles_post_ra>
// kernel: tpu_custom_call.1
= control target key start
LH: loop header
LB: loop body
LE: loop exit
PB: predicated region body
PF: predicated region fallthrough
CT: control target
= control target key end

     0   :  { %8 = vsyncpa [#allocation4], 0  ;;  %s345_s0 = inlined_call_operand.hbm [shape: f32[16,32], index: 0, kind: input, shape index: {}]   ;;  %s346_s1 = inlined_call_operand.hbm [shape: bf16[32,32], index: 1, kind: input, shape index: {}]   ;;  %s347_s2 = inlined_call_operand.vmem [shape: f32[1,32], index: 2, kind: input, shape index: {}]   ;;  %s348_s3 = inlined_call_operand.hbm [shape: bf16[16,32], index: 3, kind: output, shape index: {}]  }
   0x1   :  { %9 = vsyncpa [#allocation7], 0 }
   0x2   :  { %10 = vsyncpa [#allocation5], 0  ;;  %s266_s12 = smov [#allocation3]   ;;  %s194_s16 = scalar_lea.hbm %s345_s0, 256 }
   0x3   :  { %s16_s13 = sshll.u32 %s266_s12, 4  ;;  %p195_p0 = scmp.ne.s32.totalorder %s345_s0, %s194_s16  ;;  %s17_s13 = int_to_ptr.vmem [resolvable:$true] %s16_s13 }
   0x4   :  { %p198_p1 = scmp.lt.u32.totalorder %s194_s16, %s345_s0 }
   0x6   :  { %p200_p2 = pnand %p198_p1, %p195_p0 }
   0x8   :  { %203 = shalt.err (!%p200_p2)
}
   0x9   :  { %s204_s21 = scalar_lea.vmem %s17_s13, 256  ;;  %p209_p4 = scmp.lt.s32.totalorder %s17_s13, %s17_s13 }
   0xa   :  { %p205_p3 = scmp.ne.s32.totalorder %s17_s13, %s204_s21  ;;  %p210_p5 = scmp.lt.s32.totalorder %s204_s21, %s204_s21 }
   0xc   :  { %p211_p6 = por %p210_p5, %p209_p4 }
   0xe   :  { %p212_p7 = pnand %p211_p6, %p205_p3 }
  0x10   :  { %215 = shalt.err (!%p212_p7)
}
  0x11   :  { %s267_s22 = smov 128   ;;  %s268_s23 = smov 8  }
  0x12   :  { %22 = dma.hbm_to_vmem [thread:$0]  %s345_s0, 256, %s17_s13, [#allocation4], %s267_s22, %s267_s22, %s268_s23  }
  0x13   :  { %s269_s26 = smov [#allocation6]   ;;  %s216_s30 = scalar_lea.hbm %s346_s1, 256 }
  0x14   :  { %s28_s27 = sshll.u32 %s269_s26, 4  ;;  %p217_p8 = scmp.ne.s32.totalorder %s346_s1, %s216_s30  ;;  %s29_s27 = int_to_ptr.vmem [resolvable:$true] %s28_s27 }
  0x15   :  { %p220_p9 = scmp.lt.u32.totalorder %s216_s30, %s346_s1 }
  0x17   :  { %p222_p10 = pnand %p220_p9, %p217_p8 }
  0x19   :  { %225 = shalt.err (!%p222_p10)
}
  0x1a   :  { %s226_s8 = scalar_lea.vmem %s29_s27, 256  ;;  %p231_p12 = scmp.lt.s32.totalorder %s29_s27, %s29_s27 }
  0x1b   :  { %p227_p11 = scmp.ne.s32.totalorder %s29_s27, %s226_s8  ;;  %p232_p13 = scmp.lt.s32.totalorder %s226_s8, %s226_s8 }
  0x1d   :  { %p233_p0 = por %p232_p13, %p231_p12 }
  0x1f   :  { %p234_p1 = pnand %p233_p0, %p227_p11 }
  0x21   :  { %237 = shalt.err (!%p234_p1)
}
  0x22   :  { %s270_s0 = smov 64   ;;  %s271_s9 = smov 4  }
  0x23   :  { %34 = dma.hbm_to_vmem [thread:$0]  %s346_s1, 256, %s29_s27, [#allocation7], %s270_s0, %s270_s0, %s271_s9  }
  0x24   :  { %260 = dma.done.wait [#allocation4], 256  }
  0x25   :  { %261 = vsyncadd [#allocation4], 4294967040 }
  0x26   :  { %262 = dma.done.wait [#allocation7], 256  }
  0x27   :  { %263 = vsyncadd [#allocation7], 4294967040  ;;  %vm48_vm0 = vcmask 261120   ;;  %v272_v0 = vmov 0.0   ;;  %vm273_vm1 = vmmov 0   ;;  %v192_v1 = vld [vmem:[#allocation6] sm:$0xff]  }
  0x28   :  { %175 = vmatprep.subr.bf16.mxu0 %v272_v0  ;;  %179 = vmatprep.mubr.msk.bf16.mxu0 %vm273_vm1, %v272_v0  ;;  %49 = vst.msk [vmem:[#allocation2] sm:$0xff] %vm48_vm0, %v272_v0  ;;  %50 = vst.msk [vmem:[#allocation2 + $0x8] sm:$0xff] %vm48_vm0, %v272_v0  ;;  %v193_v2 = vld [vmem:[#allocation6 + $0x8] sm:$0xff]   ;;  %v53_v3 = vld [vmem:[#allocation3] sm:$0xff]  ;;  %vm143_vm2 = vcmask 257024   ;;  %s274_s13 = smov [#allocation8]  }
  0x29   :  { %176 = vmatpush3.bf16.msra.mxu0 %v192_v1  ;;  %v54_v4 = vld [vmem:[#allocation3 + $0x8] sm:$0xff]  ;;  %v167_v14 = vld [vmem:[%s347_s2] ss:$0 sm:$0xff]  ;;  %s151_s14 = sshll.u32 %s274_s13, 4  ;;  %s152_s14 = int_to_ptr.vmem [resolvable:$true] %s151_s14 }
  0x2a   :  { %177 = vmatprep.subr.bf16.mxu0 %v272_v0  ;;  %v55_v5 = vpack.c.bf16 %v54_v4, %v53_v3  ;;  %s238_s15 = scalar_lea.vmem %s152_s14, 128  ;;  %p243_p3 = scmp.lt.s32.totalorder %s152_s14, %s152_s14 }
  0x2b   :  { %p239_p2 = scmp.ne.s32.totalorder %s152_s14, %s238_s15  ;;  %p244_p4 = scmp.lt.s32.totalorder %s238_s15, %s238_s15 }
  0x2d   :  { %178 = vmatpush3.bf16.msra.mxu0 %v193_v2  ;;  %p245_p5 = por %p244_p4, %p243_p3 }
  0x2f   :  { %v51_v6 = vld [vmem:[#allocation2] sm:$0xff]  ;;  %v52_v8 = vld [vmem:[#allocation2 + $0x8] sm:$0xff]  ;;  %p246_p6 = pnand %p245_p5, %p239_p2 }
  0x30   :  { %180 = vmatmul.mubr.msk.bf16.vlgmr.msra.gmra.mrb[0].mxu0 %vm48_vm0, %v55_v5 }
 0x103   :  { %v110_v7 = vpop.f32.mrb[0].mxu0 }
 0x104   :  { %v117_v9 = vadd.f32 %v110_v7, %v51_v6  ;;  %v181_v10 = vpop.f32.mrb[1].mxu0 }
 0x105   :  { %v113_v11 = vpop.f32.mrb[2].mxu0 }
 0x106   :  { %119 = vst.msk [vmem:[#allocation2] sm:$0xff] %vm48_vm0, %v117_v9  ;;  %v118_v12 = vadd.f32 %v113_v11, %v52_v8  ;;  %v182_v13 = vpop.f32.mrb[3].mxu0 }
 0x108   :  { %120 = vst.msk [vmem:[#allocation2 + $0x8] sm:$0xff] %vm48_vm0, %v118_v12 }
 0x10d   :  { %v124_v15 = vld [vmem:[#allocation2] sm:$0xff] }
 0x10e   :  { %v133_v16 = vadd.f32 %v167_v14, %v124_v15 }
 0x10f   :  { %v125_v17 = vld [vmem:[#allocation2 + $0x8] sm:$0xff] }
 0x110   :  { %v134_v18 = vadd.f32 %v167_v14, %v125_v17  ;;  %v170_v19 = vpack.c.bf16 %v133_v16, %v133_v16 }
 0x112   :  { %v171_v20 = vpack.c.bf16 %v134_v18, %v134_v18  ;;  %144 = vst.msk [vmem:[#allocation8] sm:$0xf] %vm143_vm2, %v170_v19 }
 0x114   :  { %145 = vst.msk [vmem:[#allocation8 + $0x4] sm:$0xf] %vm143_vm2, %v171_v20 }
 0x115   :  { %249 = shalt.err (!%p246_p6)
}
 0x116   :  { %s250_s17 = scalar_lea.hbm %s348_s3, 128 }
 0x117   :  { %p251_p7 = scmp.ne.s32.totalorder %s348_s3, %s250_s17  ;;  %p254_p8 = scmp.lt.u32.totalorder %s250_s17, %s348_s3 }
 0x119   :  { %p256_p9 = pnand %p254_p8, %p251_p7 }
 0x11b   :  { %259 = shalt.err (!%p256_p9)
}
 0x11c   :  { %157 = dma.vmem_to_hbm [thread:$0]  %s152_s14, 128, %s348_s3, [#allocation5], %s270_s0, %s270_s0, %s271_s9  }
 0x11d   :  { %264 = dma.done.wait [#allocation5], 128  }
 0x11e   :  { %265 = vsyncadd [#allocation5], 4294967168 }
 0x11f   :  { %161 = vsyncpa [#allocation4], 1 }
 0x120   :  { %162 = vsyncpa [#allocation7], 1 }
 0x121   :  { %163 = vsyncpa [#allocation5], 1 }

</bundles_post_ra>
